<compile_context>
chip_gen: v5e
topology: v5e:2x2
jax: 0.10.0
libtpu: 0.0.40
codegen_flags: <defaults>
</compile_context>

<pallas_src>
import jax
import jax.numpy as jnp
from jax.experimental import pallas as pl
from jax.experimental.pallas import tpu as pltpu

_LANE = 128      # lane (last-dim) tile
_SUBLANE = 8     # sublane (second-to-last dim) tile


def _round_up(n, m):
    return ((n + m - 1) // m) * m


def agent_kernel(x_ref, w1_ref, b1_ref, w2_ref, b2_ref, w3_ref, b3_ref, o_ref):
    # Layer 1: [TB, OBS_P] @ [OBS_P, H_P] + [1, H_P]
    h = jnp.dot(x_ref[...], w1_ref[...], preferred_element_type=jnp.float32)
    h = h + b1_ref[...]
    # Layer 2: [TB, H_P] @ [H_P, H_P] + [1, H_P]
    h = jnp.dot(h, w2_ref[...], preferred_element_type=jnp.float32)
    h = h + b2_ref[...]
    # Layer 3: [TB, H_P] @ [H_P, A_P] + [1, A_P]
    h = jnp.dot(h, w3_ref[...], preferred_element_type=jnp.float32)
    h = h + b3_ref[...]
    # torch.clamp(x, 0, 1); padded action lanes are exactly 0 and stay 0.
    o_ref[...] = jnp.clip(h, 0.0, 1.0).astype(o_ref.dtype)


def agent_forward(x, padded_params, action_size, *, block_batch=512):
    """x: [B, obs] (unpadded). padded_params: lane-padded (W, b) tuple.

    Returns [B, action_size] float32.
    """
    w1, b1, w2, b2, w3, b3 = padded_params
    B, obs = x.shape
    OBS_P, H_P = w1.shape
    A_P = w3.shape[1]

    # Batch tile: multiple of the 8-row sublane, capped at block_batch.
    tb = min(block_batch, _round_up(B, _SUBLANE))
    B_pad = _round_up(B, tb)
    n_blocks = B_pad // tb

    # Zero-pad x on both batch (sublane/grid) and feature (lane) axes; padded
    # feature columns hit zero weight rows, so they contribute exactly 0.
    x_p = jnp.zeros((B_pad, OBS_P), x.dtype).at[:B, :obs].set(x)

    batch_map = lambda i: (i, 0)   # x / out tiles march down the batch axis
    const_map = lambda i: (0, 0)   # weights & biases stay VMEM-resident

    out_padded = pl.pallas_call(
        agent_kernel,
        out_shape=jax.ShapeDtypeStruct((B_pad, A_P), jnp.float32),
        grid=(n_blocks,),
        in_specs=[
            pl.BlockSpec((tb, OBS_P), batch_map),
            pl.BlockSpec((OBS_P, H_P), const_map),
            pl.BlockSpec((1, H_P), const_map),
            pl.BlockSpec((H_P, H_P), const_map),
            pl.BlockSpec((1, H_P), const_map),
            pl.BlockSpec((H_P, A_P), const_map),
            pl.BlockSpec((1, A_P), const_map),
        ],
        out_specs=pl.BlockSpec((tb, A_P), batch_map),
        compiler_params=pltpu.CompilerParams(
            dimension_semantics=("parallel",)),
    )(x_p, w1, b1, w2, b2, w3, b3)

    # Slice away batch padding and the zero-padded action lanes.
    return out_padded[:B, :action_size]


def init_params(key, obs_size, action_size, hidden_size):
    """Deterministic init mimicking nn.Linear's uniform(-1/sqrt(fan_in), ...).

    Weights are stored as [in_features, out_features] (so the kernel does
    x @ W, equivalent to PyTorch's x @ W.T). Biases are [1, out] rows.
    Returned UNPADDED (use pad_params before calling agent_forward).
    """
    ks = jax.random.split(key, 6)

    def linear(kw, kb, fan_in, fan_out):
        bound = 1.0 / jnp.sqrt(jnp.float32(fan_in))
        w = jax.random.uniform(kw, (fan_in, fan_out), jnp.float32, -bound, bound)
        b = jax.random.uniform(kb, (1, fan_out), jnp.float32, -bound, bound)
        return w, b

    w1, b1 = linear(ks[0], ks[1], obs_size, hidden_size)
    w2, b2 = linear(ks[2], ks[3], hidden_size, hidden_size)
    w3, b3 = linear(ks[4], ks[5], hidden_size, action_size)
    return (w1, b1, w2, b2, w3, b3)


def pad_params(params):
    """Zero-pad every feature dim to a multiple of 128 lanes (done once)."""
    w1, b1, w2, b2, w3, b3 = params

    def pad_w(w):
        fi, fo = w.shape
        fip, fop = _round_up(fi, _LANE), _round_up(fo, _LANE)
        return jnp.zeros((fip, fop), w.dtype).at[:fi, :fo].set(w)

    def pad_b(b):
        fo = b.shape[1]
        fop = _round_up(fo, _LANE)
        return jnp.zeros((1, fop), b.dtype).at[:, :fo].set(b)

    return (pad_w(w1), pad_b(b1), pad_w(w2), pad_b(b2), pad_w(w3), pad_b(b3))


def reference_forward(x, params):
    w1, b1, w2, b2, w3, b3 = params
    h = x @ w1 + b1
    h = h @ w2 + b2
    h = h @ w3 + b3
    return jnp.clip(h, 0.0, 1.0)


if __name__ == "__main__":
    obs_size, action_size, hidden_size = 16, 4, 32
    batch = 8

    key = jax.random.PRNGKey(0)
    kx, kp = jax.random.split(key)
    x = jax.random.normal(kx, (batch, obs_size), dtype=jnp.float32)

    params = init_params(kp, obs_size, action_size, hidden_size)
    padded_params = pad_params(params)

    # NOTE: at batch=8 this forward is launch/DMA-overhead bound by nature;
    # the padded, gridded kernel only pays off at large batch (its intended use).
    out = agent_forward(x, padded_params, action_size)
    out = jax.block_until_ready(out)

    ref = reference_forward(x, params)
    assert out.shape == (batch, action_size)
    assert jnp.allclose(out, ref, atol=1e-5, rtol=1e-5)

    print("KERNEL_OK")
</pallas_src>

<mosaic_0001>
module attributes {stable_mosaic.version = 11 : i64} {
  func.func @agent_kernel(%arg0: i32, %arg1: memref<8x128xf32, #tpu.memory_space<vmem>>, %arg2: memref<128x128xf32, #tpu.memory_space<vmem>>, %arg3: memref<1x128xf32, #tpu.memory_space<vmem>>, %arg4: memref<128x128xf32, #tpu.memory_space<vmem>>, %arg5: memref<1x128xf32, #tpu.memory_space<vmem>>, %arg6: memref<128x128xf32, #tpu.memory_space<vmem>>, %arg7: memref<1x128xf32, #tpu.memory_space<vmem>>, %arg8: memref<8x128xf32, #tpu.memory_space<vmem>>) attributes {dimension_semantics = [#tpu.dimension_semantics<parallel>], iteration_bounds = array<i64: 1>, scalar_prefetch = 0 : i64, scratch_operands = 0 : i64, tpu.core_type = #tpu.core_type<tc>, window_params = [{transform_indices = @transform_0, window_bounds = array<i64: 8, 128>}, {pipeline_mode = #tpu.pipeline_mode<synchronous>, transform_indices = @transform_1, window_bounds = array<i64: 128, 128>}, {pipeline_mode = #tpu.pipeline_mode<synchronous>, transform_indices = @transform_2, window_bounds = array<i64: 1, 128>}, {pipeline_mode = #tpu.pipeline_mode<synchronous>, transform_indices = @transform_3, window_bounds = array<i64: 128, 128>}, {pipeline_mode = #tpu.pipeline_mode<synchronous>, transform_indices = @transform_4, window_bounds = array<i64: 1, 128>}, {pipeline_mode = #tpu.pipeline_mode<synchronous>, transform_indices = @transform_5, window_bounds = array<i64: 128, 128>}, {pipeline_mode = #tpu.pipeline_mode<synchronous>, transform_indices = @transform_6, window_bounds = array<i64: 1, 128>}, {transform_indices = @transform_7, window_bounds = array<i64: 8, 128>}]} {
    %c0 = arith.constant 0 : index
    %c0_0 = arith.constant 0 : index
    %0 = vector.load %arg1[%c0, %c0_0] : memref<8x128xf32, #tpu.memory_space<vmem>>, vector<8x128xf32>
    %c0_1 = arith.constant 0 : index
    %c0_2 = arith.constant 0 : index
    %1 = vector.load %arg2[%c0_1, %c0_2] : memref<128x128xf32, #tpu.memory_space<vmem>>, vector<128x128xf32>
    %cst = arith.constant dense<0.000000e+00> : vector<8x128xf32>
    %2 = tpu.matmul %0, %1, %cst {dimension_numbers = #tpu.dot_dimension_numbers<[1], [0], [0], [1], [0, 0, 1, 1], [], []>} : vector<8x128xf32>, vector<128x128xf32>, vector<8x128xf32> -> vector<8x128xf32>
    %c0_3 = arith.constant 0 : index
    %c0_4 = arith.constant 0 : index
    %3 = vector.load %arg3[%c0_3, %c0_4] : memref<1x128xf32, #tpu.memory_space<vmem>>, vector<1x128xf32>
    %4 = vector.broadcast %3 : vector<1x128xf32> to vector<8x128xf32>
    %5 = arith.addf %2, %4 : vector<8x128xf32>
    %c0_5 = arith.constant 0 : index
    %c0_6 = arith.constant 0 : index
    %6 = vector.load %arg4[%c0_5, %c0_6] : memref<128x128xf32, #tpu.memory_space<vmem>>, vector<128x128xf32>
    %cst_7 = arith.constant dense<0.000000e+00> : vector<8x128xf32>
    %7 = tpu.matmul %5, %6, %cst_7 {dimension_numbers = #tpu.dot_dimension_numbers<[1], [0], [0], [1], [0, 0, 1, 1], [], []>} : vector<8x128xf32>, vector<128x128xf32>, vector<8x128xf32> -> vector<8x128xf32>
    %c0_8 = arith.constant 0 : index
    %c0_9 = arith.constant 0 : index
    %8 = vector.load %arg5[%c0_8, %c0_9] : memref<1x128xf32, #tpu.memory_space<vmem>>, vector<1x128xf32>
    %9 = vector.broadcast %8 : vector<1x128xf32> to vector<8x128xf32>
    %10 = arith.addf %7, %9 : vector<8x128xf32>
    %c0_10 = arith.constant 0 : index
    %c0_11 = arith.constant 0 : index
    %11 = vector.load %arg6[%c0_10, %c0_11] : memref<128x128xf32, #tpu.memory_space<vmem>>, vector<128x128xf32>
    %cst_12 = arith.constant dense<0.000000e+00> : vector<8x128xf32>
    %12 = tpu.matmul %10, %11, %cst_12 {dimension_numbers = #tpu.dot_dimension_numbers<[1], [0], [0], [1], [0, 0, 1, 1], [], []>} : vector<8x128xf32>, vector<128x128xf32>, vector<8x128xf32> -> vector<8x128xf32>
    %c0_13 = arith.constant 0 : index
    %c0_14 = arith.constant 0 : index
    %13 = vector.load %arg7[%c0_13, %c0_14] : memref<1x128xf32, #tpu.memory_space<vmem>>, vector<1x128xf32>
    %14 = vector.broadcast %13 : vector<1x128xf32> to vector<8x128xf32>
    %15 = arith.addf %12, %14 : vector<8x128xf32>
    %cst_15 = arith.constant 0.000000e+00 : f32
    %cst_16 = arith.constant 1.000000e+00 : f32
    %16 = vector.broadcast %cst_15 : f32 to vector<8x128xf32>
    %17 = arith.maximumf %16, %15 : vector<8x128xf32>
    %18 = vector.broadcast %cst_16 : f32 to vector<8x128xf32>
    %19 = arith.minimumf %18, %17 : vector<8x128xf32>
    %c0_17 = arith.constant 0 : index
    %c0_18 = arith.constant 0 : index
    %20 = vector.load %arg8[%c0_17, %c0_18] : memref<8x128xf32, #tpu.memory_space<vmem>>, vector<8x128xf32>
    tpu.vector_store %arg8[%c0_17, %c0_18], %19 {strides = array<i32>} : memref<8x128xf32, #tpu.memory_space<vmem>>, vector<8x128xf32>,
    return
  }
  func.func @transform_0(%arg0: i32) -> (i32, i32) {
    %c0_i32 = arith.constant 0 : i32
    %c0_i32_0 = arith.constant 0 : i32
    return %arg0, %c0_i32 : i32, i32
  }
  func.func @transform_1(%arg0: i32) -> (i32, i32) {
    %c0_i32 = arith.constant 0 : i32
    %c0_i32_0 = arith.constant 0 : i32
    %c0_i32_1 = arith.constant 0 : i32
    return %c0_i32, %c0_i32_0 : i32, i32
  }
  func.func @transform_2(%arg0: i32) -> (i32, i32) {
    %c0_i32 = arith.constant 0 : i32
    %c0_i32_0 = arith.constant 0 : i32
    %c0_i32_1 = arith.constant 0 : i32
    return %c0_i32, %c0_i32_0 : i32, i32
  }
  func.func @transform_3(%arg0: i32) -> (i32, i32) {
    %c0_i32 = arith.constant 0 : i32
    %c0_i32_0 = arith.constant 0 : i32
    %c0_i32_1 = arith.constant 0 : i32
    return %c0_i32, %c0_i32_0 : i32, i32
  }
  func.func @transform_4(%arg0: i32) -> (i32, i32) {
    %c0_i32 = arith.constant 0 : i32
    %c0_i32_0 = arith.constant 0 : i32
    %c0_i32_1 = arith.constant 0 : i32
    return %c0_i32, %c0_i32_0 : i32, i32
  }
  func.func @transform_5(%arg0: i32) -> (i32, i32) {
    %c0_i32 = arith.constant 0 : i32
    %c0_i32_0 = arith.constant 0 : i32
    %c0_i32_1 = arith.constant 0 : i32
    return %c0_i32, %c0_i32_0 : i32, i32
  }
  func.func @transform_6(%arg0: i32) -> (i32, i32) {
    %c0_i32 = arith.constant 0 : i32
    %c0_i32_0 = arith.constant 0 : i32
    %c0_i32_1 = arith.constant 0 : i32
    return %c0_i32, %c0_i32_0 : i32, i32
  }
  func.func @transform_7(%arg0: i32) -> (i32, i32) {
    %c0_i32 = arith.constant 0 : i32
    %c0_i32_0 = arith.constant 0 : i32
    return %arg0, %c0_i32 : i32, i32
  }
}

</mosaic_0001>

<bundles_post_ra>
// kernel: tpu_custom_call.1
= control target key start
LH: loop header
LB: loop body
LE: loop exit
PB: predicated region body
PF: predicated region fallthrough
CT: control target
= control target key end

     0   :  { %12 = vsyncpa [#allocation3], 0  ;;  %s440_s0 = inlined_call_operand.hbm [shape: f32[8,128], index: 0, kind: input, shape index: {}]   ;;  %s441_s1 = inlined_call_operand.hbm [shape: f32[128,128], index: 1, kind: input, shape index: {}]   ;;  %s442_s2 = inlined_call_operand.vmem [shape: f32[1,128], index: 2, kind: input, shape index: {}]   ;;  %s443_s3 = inlined_call_operand.hbm [shape: f32[128,128], index: 3, kind: input, shape index: {}]   ;;  %s444_s4 = inlined_call_operand.vmem [shape: f32[1,128], index: 4, kind: input, shape index: {}]   ;;  %s445_s5 = inlined_call_operand.hbm [shape: f32[128,128], index: 5, kind: input, shape index: {}]   ;;  %s446_s6 = inlined_call_operand.vmem [shape: f32[1,128], index: 6, kind: input, shape index: {}]   ;;  %s447_s7 = inlined_call_operand.hbm [shape: f32[8,128], index: 7, kind: output, shape index: {}]  }
   0x1   :  { %13 = vsyncpa [#allocation6], 0 }
   0x2   :  { %14 = vsyncpa [#allocation9], 0  ;;  %s31_s26 = sshll.u32 %s441_s1, 4  ;;  %s32_s26 = int_to_ptr.hbm [resolvable:$true] %s31_s26 }
   0x3   :  { %15 = vsyncpa [#allocation4], 0  ;;  %s369_s27 = smov [#allocation5]   ;;  %s21_s8 = sshll.u32 %s440_s0, 4  ;;  %s22_s8 = int_to_ptr.hbm [resolvable:$true] %s21_s8 }
   0x4   :  { %s33_s28 = sshll.u32 %s369_s27, 4  ;;  %s370_s9 = smov 128   ;;  %s34_s28 = int_to_ptr.vmem [resolvable:$true] %s33_s28 }
   0x5   :  { %s371_s10 = smov 8   ;;  %s372_s11 = smov [#allocation2]  }
   0x6   :  { %39 = dma.hbm_to_vmem [thread:$0]  %s32_s26, 2048, %s34_s28, [#allocation6], %s370_s9, %s370_s9, %s371_s10  }
   0x7   :  { %s23_s12 = sshll.u32 %s372_s11, 4  ;;  %s46_s15 = sshll.u32 %s443_s3, 4  ;;  %s24_s12 = int_to_ptr.vmem [resolvable:$true] %s23_s12  ;;  %s47_s15 = int_to_ptr.hbm [resolvable:$true] %s46_s15 }
   0x8   :  { %26 = dma.hbm_to_vmem [thread:$0]  %s22_s8, 128, %s24_s12, [#allocation3]  }
   0x9   :  { %s61_s17 = sshll.u32 %s445_s5, 4  ;;  %s373_s18 = smov [#allocation7]   ;;  %s62_s17 = int_to_ptr.hbm [resolvable:$true] %s61_s17 }
   0xa   :  { %s48_s19 = sshll.u32 %s373_s18, 4  ;;  %s374_s0 = smov [#allocation8]   ;;  %s49_s19 = int_to_ptr.vmem [resolvable:$true] %s48_s19 }
   0xb   :  { %54 = dma.hbm_to_vmem [thread:$0]  %s47_s15, 2048, %s49_s19, [#allocation6], %s370_s9, %s370_s9, %s371_s10  }
   0xc   :  { %s63_s20 = sshll.u32 %s374_s0, 4  ;;  %s64_s20 = int_to_ptr.vmem [resolvable:$true] %s63_s20 }
   0xd   :  { %69 = dma.hbm_to_vmem [thread:$0]  %s62_s17, 2048, %s64_s20, [#allocation9], %s370_s9, %s370_s9, %s371_s10  }
   0xe   :  { %361 = dma.done.wait [#allocation3], 128  }
   0xf   :  { %362 = vsyncadd [#allocation3], 4294967168 }
  0x10   :  { %363 = dma.done.wait [#allocation6], 4096  }
  0x11   :  { %364 = vsyncadd [#allocation6], 4294963200 }
  0x12   :  { %365 = dma.done.wait [#allocation9], 2048  }
  0x13   :  { %366 = vsyncadd [#allocation9], 4294965248  ;;  %v104_v0 = vld [vmem:[#allocation5 + $0x78] sm:$0xff]  ;;  %v103_v1 = vld [vmem:[#allocation5 + $0x70] sm:$0xff]  ;;  %s219_s28 = sshll.u32 %s447_s7, 4  ;;  %s220_s28 = int_to_ptr.hbm [resolvable:$true] %s219_s28 }
  0x14   :  { %109 = vmatpush.msra.mxu0 %v104_v0  ;;  %v102_v2 = vld [vmem:[#allocation5 + $0x68] sm:$0xff]  ;;  %v101_v3 = vld [vmem:[#allocation5 + $0x60] sm:$0xff]  ;;  %v144_v4 = vld [vmem:[#allocation7 + $0x78] sm:$0xff] }
  0x15   :  { %v100_v5 = vld [vmem:[#allocation5 + $0x58] sm:$0xff]  ;;  %149 = vmatpush.msra.mxu1 %v144_v4  ;;  %v143_v6 = vld [vmem:[#allocation7 + $0x70] sm:$0xff]  ;;  %v142_v7 = vld [vmem:[#allocation7 + $0x68] sm:$0xff] }
  0x16   :  { %110 = vmatpush.msra.mxu0 %v103_v1  ;;  %v99_v8 = vld [vmem:[#allocation5 + $0x50] sm:$0xff]  ;;  %v141_v9 = vld [vmem:[#allocation7 + $0x60] sm:$0xff]  ;;  %v98_v10 = vld [vmem:[#allocation5 + $0x48] sm:$0xff] }
  0x17   :  { %150 = vmatpush.msra.mxu1 %v143_v6  ;;  %v140_v11 = vld [vmem:[#allocation7 + $0x58] sm:$0xff]  ;;  %v97_v12 = vld [vmem:[#allocation5 + $0x40] sm:$0xff]  ;;  %v139_v13 = vld [vmem:[#allocation7 + $0x50] sm:$0xff] }
  0x18   :  { %111 = vmatpush.msra.mxu0 %v102_v2  ;;  %v96_v14 = vld [vmem:[#allocation5 + $0x38] sm:$0xff]  ;;  %v138_v15 = vld [vmem:[#allocation7 + $0x48] sm:$0xff]  ;;  %v95_v16 = vld [vmem:[#allocation5 + $0x30] sm:$0xff] }
  0x19   :  { %151 = vmatpush.msra.mxu1 %v142_v7  ;;  %v137_v17 = vld [vmem:[#allocation7 + $0x40] sm:$0xff]  ;;  %v94_v18 = vld [vmem:[#allocation5 + $0x28] sm:$0xff]  ;;  %v136_v19 = vld [vmem:[#allocation7 + $0x38] sm:$0xff] }
  0x1a   :  { %112 = vmatpush.msra.mxu0 %v101_v3  ;;  %v93_v20 = vld [vmem:[#allocation5 + $0x20] sm:$0xff]  ;;  %v135_v21 = vld [vmem:[#allocation7 + $0x30] sm:$0xff]  ;;  %v92_v22 = vld [vmem:[#allocation5 + $0x18] sm:$0xff] }
  0x1b   :  { %152 = vmatpush.msra.mxu1 %v141_v9  ;;  %v134_v23 = vld [vmem:[#allocation7 + $0x28] sm:$0xff]  ;;  %v91_v24 = vld [vmem:[#allocation5 + $0x10] sm:$0xff]  ;;  %v133_v25 = vld [vmem:[#allocation7 + $0x20] sm:$0xff] }
  0x1c   :  { %113 = vmatpush.msra.mxu0 %v100_v5  ;;  %v90_v26 = vld [vmem:[#allocation5 + $0x8] sm:$0xff]  ;;  %v132_v27 = vld [vmem:[#allocation7 + $0x18] sm:$0xff]  ;;  %v89_v28 = vld [vmem:[#allocation5] sm:$0xff] }
  0x1d   :  { %153 = vmatpush.msra.mxu1 %v140_v11  ;;  %v88_v29 = vld [vmem:[#allocation2] sm:$0xff]  ;;  %v131_v30 = vld [vmem:[#allocation7 + $0x10] sm:$0xff]  ;;  %v130_v31 = vld [vmem:[#allocation7 + $0x8] sm:$0xff] }
  0x1e   :  { %114 = vmatpush.msra.mxu0 %v99_v8  ;;  %v129_v32 = vld [vmem:[#allocation7] sm:$0xff]  ;;  %v184_v33 = vld [vmem:[#allocation8 + $0x78] sm:$0xff]  ;;  %v183_v34 = vld [vmem:[#allocation8 + $0x70] sm:$0xff] }
  0x1f   :  { %154 = vmatpush.msra.mxu1 %v139_v13  ;;  %189 = vmatpush.msra.mxu2 %v184_v33  ;;  %v182_v35 = vld [vmem:[#allocation8 + $0x68] sm:$0xff]  ;;  %v181_v36 = vld [vmem:[#allocation8 + $0x60] sm:$0xff]  ;;  %v180_v37 = vld [vmem:[#allocation8 + $0x58] sm:$0xff] }
  0x20   :  { %115 = vmatpush.msra.mxu0 %v98_v10  ;;  %v179_v38 = vld [vmem:[#allocation8 + $0x50] sm:$0xff]  ;;  %v178_v39 = vld [vmem:[#allocation8 + $0x48] sm:$0xff]  ;;  %v177_v40 = vld [vmem:[#allocation8 + $0x40] sm:$0xff] }
  0x21   :  { %155 = vmatpush.msra.mxu1 %v138_v15  ;;  %190 = vmatpush.msra.mxu2 %v183_v34  ;;  %v176_v41 = vld [vmem:[#allocation8 + $0x38] sm:$0xff]  ;;  %v175_v42 = vld [vmem:[#allocation8 + $0x30] sm:$0xff]  ;;  %v174_v43 = vld [vmem:[#allocation8 + $0x28] sm:$0xff] }
  0x22   :  { %116 = vmatpush.msra.mxu0 %v97_v12  ;;  %v173_v44 = vld [vmem:[#allocation8 + $0x20] sm:$0xff]  ;;  %v172_v45 = vld [vmem:[#allocation8 + $0x18] sm:$0xff]  ;;  %v171_v46 = vld [vmem:[#allocation8 + $0x10] sm:$0xff] }
  0x23   :  { %156 = vmatpush.msra.mxu1 %v137_v17  ;;  %191 = vmatpush.msra.mxu2 %v182_v35  ;;  %v238_v47 = vld [vmem:[%s442_s2] ss:$0 sm:$0xff]  ;;  %v170_v50 = vld [vmem:[#allocation8 + $0x8] sm:$0xff]  ;;  %v169_v51 = vld [vmem:[#allocation8] sm:$0xff]  ;;  %s375_s2 = smov [#allocation10]  }
  0x24   :  { %117 = vmatpush.msra.mxu0 %v96_v14  ;;  %v239_v52 = vld [vmem:[%s444_s4] ss:$0 sm:$0xff]  ;;  %s217_s25 = sshll.u32 %s375_s2, 4  ;;  %s218_s25 = int_to_ptr.vmem [resolvable:$true] %s217_s25 }
  0x25   :  { %157 = vmatpush.msra.mxu1 %v136_v19  ;;  %192 = vmatpush.msra.mxu2 %v181_v36  ;;  %v240_v55 = vld [vmem:[%s446_s6] ss:$0 sm:$0xff] }
  0x26   :  { %118 = vmatpush.msra.mxu0 %v95_v16 }
  0x27   :  { %158 = vmatpush.msra.mxu1 %v135_v21  ;;  %193 = vmatpush.msra.mxu2 %v180_v37 }
  0x28   :  { %119 = vmatpush.msra.mxu0 %v94_v18 }
  0x29   :  { %159 = vmatpush.msra.mxu1 %v134_v23  ;;  %194 = vmatpush.msra.mxu2 %v179_v38 }
  0x2a   :  { %120 = vmatpush.msra.mxu0 %v93_v20 }
  0x2b   :  { %160 = vmatpush.msra.mxu1 %v133_v25  ;;  %195 = vmatpush.msra.mxu2 %v178_v39 }
  0x2c   :  { %121 = vmatpush.msra.mxu0 %v92_v22 }
  0x2d   :  { %161 = vmatpush.msra.mxu1 %v132_v27  ;;  %196 = vmatpush.msra.mxu2 %v177_v40 }
  0x2e   :  { %122 = vmatpush.msra.mxu0 %v91_v24 }
  0x2f   :  { %162 = vmatpush.msra.mxu1 %v131_v30  ;;  %197 = vmatpush.msra.mxu2 %v176_v41 }
  0x30   :  { %123 = vmatpush.msra.mxu0 %v90_v26 }
  0x31   :  { %163 = vmatpush.msra.mxu1 %v130_v31  ;;  %198 = vmatpush.msra.mxu2 %v175_v42 }
  0x32   :  { %124 = vmatpush.msra.mxu0 %v89_v28 }
  0x33   :  { %125 = vmatmul.f32.vlgmr.msra.gmra.mxu0 %v88_v29  ;;  %164 = vmatpush.msra.mxu1 %v129_v32 }
  0x34   :  { %199 = vmatpush.msra.mxu2 %v174_v43 }
  0x36   :  { %200 = vmatpush.msra.mxu2 %v173_v44 }
  0x38   :  { %201 = vmatpush.msra.mxu2 %v172_v45 }
  0x3a   :  { %202 = vmatpush.msra.mxu2 %v171_v46 }
  0x3c   :  { %203 = vmatpush.msra.mxu2 %v170_v50 }
  0x3e   :  { %204 = vmatpush.msra.mxu2 %v169_v51 }
  0xb0   :  { %v126_v48 = vpop.f32.mrf.mxu0 }
  0xb1   :  { %v127_v49 = vadd.f32 %v238_v47, %v126_v48 }
  0xb3   :  { %165 = vmatmul.f32.vlgmr.msra.gmra.mxu1 %v127_v49 }
 0x130   :  { %v166_v53 = vpop.f32.mrf.mxu1 }
 0x131   :  { %v167_v54 = vadd.f32 %v239_v52, %v166_v53 }
 0x133   :  { %205 = vmatmul.f32.vlgmr.msra.gmra.mxu2 %v167_v54 }
 0x1b6   :  { %v206_v56 = vpop.f32.mrf.mxu2 }
 0x1b7   :  { %v207_v57 = vadd.f32 %v240_v55, %v206_v56 }
 0x1b9   :  { %v209_v58 = vmax.f32 %v207_v57, 0.0 }
 0x1bb   :  { %v210_v59 = vmin.f32 %v209_v58, 1.0 }
 0x1bd   :  { %211 = vst [vmem:[#allocation10] sm:$0xff] %v210_v59 }
 0x1be   :  { %222 = dma.vmem_to_hbm [thread:$0]  %s218_s25, 128, %s220_s28, [#allocation4]  }
 0x1bf   :  { %367 = dma.done.wait [#allocation4], 128  }
 0x1c0   :  { %368 = vsyncadd [#allocation4], 4294967168 }
 0x1c1   :  { %227 = vsyncpa [#allocation3], 1 }
 0x1c2   :  { %228 = vsyncpa [#allocation6], 1 }
 0x1c3   :  { %229 = vsyncpa [#allocation9], 1 }
 0x1c4   :  { %230 = vsyncpa [#allocation4], 1 }

</bundles_post_ra>
